<compile_context>
chip_gen: v6e
topology: v6e:2x2x1
jax: 0.10.0
libtpu: 0.0.40
codegen_flags: <defaults>
</compile_context>

<pallas_src>
import jax
import jax.numpy as jnp
from jax.experimental import pallas as pl
from jax.experimental.pallas import tpu as pltpu


def censor_net_kernel(x_ref, gt_ref, wi_ref, wh_ref, b_ref, dec_ref,
                      loss_ref, hs_ref):
    Ts, B, H = hs_ref.shape            # (T-1, batch, hidden)

    # --- hoisted input projection: ONE batched matmul + ONE packed bias row -------------
    # gate-major column order (PyTorch GRUCell): r | z | n ; r/z biases pre-combined (b_i*+b_h*)
    gi = jnp.dot(x_ref[...], wi_ref[...],
                 preferred_element_type=jnp.float32) + b_ref[0:1, :]      # ((T-1)*B, 3H)

    wh = wh_ref[...]                   # (H, 3H) packed recurrent weights
    bhn = b_ref[1:2, :H]               # (1, H)  hidden bias of the n gate

    # --- recurrence: ONE (B,H)@(H,3H) MXU op + packed gate math per step -----------------
    h = jnp.zeros((B, H), jnp.float32)
    for t in range(Ts):                                        # static unroll, static offsets
        gh = jnp.dot(h, wh, preferred_element_type=jnp.float32)          # (B, 3H)
        gi_t = gi[t * B:(t + 1) * B, :]                                   # (B, 3H) static slice
        rz = jax.nn.sigmoid(gi_t[:, :2 * H] + gh[:, :2 * H])             # packed r|z sigmoid
        r = rz[:, :H]
        z = rz[:, H:]
        n = jnp.tanh(gi_t[:, 2 * H:] + r * (gh[:, 2 * H:] + bhn))
        h = (1.0 - z) * n + z * h
        hs_ref[t] = h                                          # hidden history (off crit path)

    # --- decoder + sigmoid + BCE(reduction='sum'), vectorized & lane-dense ---------------
    hs = hs_ref[...]                                           # (Ts, B, H)
    wd = dec_ref[0:1, :H]                                      # (1, H) decoder weight row
    bd = dec_ref[0:1, H:H + 1]                                 # (1, 1) decoder bias
    logits = jnp.sum(hs * wd[None, :, :], axis=-1) + bd        # (Ts, B)  (VPU mul + lane reduce)
    c = jax.nn.sigmoid(logits)
    tgt = gt_ref[...]                                          # (Ts, B)  targets gt[t+1]

    # PyTorch BCELoss clamps the log terms at -100
    log_c = jnp.maximum(jnp.log(c), -100.0)
    log_1mc = jnp.maximum(jnp.log(1.0 - c), -100.0)
    per = tgt * log_c + (1.0 - tgt) * log_1mc                  # (Ts, B)

    row = jnp.sum(per, axis=1, keepdims=True)                  # (Ts, 1) lane reduce
    loss_ref[...] = -jnp.sum(row, axis=0, keepdims=True)       # single (1, 1) store


def pack_params(params):
    """One-time host-side packing/transposition (cache & reuse across forward calls)."""
    wih, whh, bih, bhh, wd, bd = params
    H = whh.shape[1]
    b_ir, b_iz, b_in = bih[:H], bih[H:2 * H], bih[2 * H:]
    b_hr, b_hz, b_hn = bhh[:H], bhh[H:2 * H], bhh[2 * H:]

    wi_packed = wih.T.astype(jnp.float32)                      # (D, 3H)  columns r|z|n
    wh_packed = whh.T.astype(jnp.float32)                      # (H, 3H)  columns r|z|n
    bias_in = jnp.concatenate([b_ir + b_hr, b_iz + b_hz, b_in])            # (3H,)
    bias_hn = jnp.concatenate([b_hn, jnp.zeros((2 * H,), jnp.float32)])    # (3H,)
    bias_packed = jnp.stack([bias_in, bias_hn], axis=0).astype(jnp.float32)  # (2, 3H)
    dec_packed = jnp.concatenate([wd.reshape(1, H), bd.reshape(1, 1)],
                                 axis=1).astype(jnp.float32)   # (1, H+1)
    return wi_packed, wh_packed, bias_packed, dec_packed


def censor_net_forward(x, gt, packed):
    """x: (T, B, D) f32, gt: (T, B, 1) f32. Returns scalar nll_loss (f32)."""
    T, B, D = x.shape
    wi_packed, wh_packed, bias_packed, dec_packed = packed
    H = wh_packed.shape[0]
    H3 = 3 * H
    Ts = T - 1
    if Ts <= 0:                        # degenerate T == 1: loop body never runs
        return jnp.float32(0.0)

    x_flat = x[:Ts].reshape(Ts * B, D)          # all timesteps for the fused projection
    gt_dense = gt[1:, :, 0]                      # (Ts, B) lane-dense targets

    vmem = pl.BlockSpec(memory_space=pltpu.MemorySpace.VMEM)
    cost = pl.CostEstimate(
        flops=2 * Ts * B * D * H3 + 2 * Ts * B * H * H3 + 2 * Ts * B * H,
        transcendentals=Ts * B * (H3 + 3),
        bytes_accessed=4 * (x_flat.size + gt_dense.size + wi_packed.size
                            + wh_packed.size + bias_packed.size + dec_packed.size + 1),
    )

    loss = pl.pallas_call(
        censor_net_kernel,
        out_shape=jax.ShapeDtypeStruct((1, 1), jnp.float32),
        in_specs=[vmem] * 6,
        out_specs=vmem,
        scratch_shapes=[pltpu.VMEM((Ts, B, H), jnp.float32)],   # hidden-state history
        cost_estimate=cost,
    )(x_flat, gt_dense, wi_packed, wh_packed, bias_packed, dec_packed)

    return loss[0, 0]


def init_params(key, input_size, hidden_size):
    """Deterministic init matching PyTorch GRUCell / Linear parameter shapes."""
    ks = jax.random.split(key, 6)
    s = 1.0 / jnp.sqrt(hidden_size)
    wih = jax.random.uniform(ks[0], (3 * hidden_size, input_size), jnp.float32, -s, s)
    whh = jax.random.uniform(ks[1], (3 * hidden_size, hidden_size), jnp.float32, -s, s)
    bih = jax.random.uniform(ks[2], (3 * hidden_size,), jnp.float32, -s, s)
    bhh = jax.random.uniform(ks[3], (3 * hidden_size,), jnp.float32, -s, s)
    wd = jax.random.uniform(ks[4], (1, hidden_size), jnp.float32, -s, s)
    bd = jax.random.uniform(ks[5], (1,), jnp.float32, -s, s)
    return wih, whh, bih, bhh, wd, bd


if __name__ == "__main__":
    T, B, D, H = 8, 8, 16, 32   # seq=8, batch=8, input_size=16, hidden=32

    key = jax.random.PRNGKey(0)
    k_x, k_gt, k_p = jax.random.split(key, 3)

    x = jax.random.normal(k_x, (T, B, D), dtype=jnp.float32)
    gt = jax.random.bernoulli(k_gt, 0.5, (T, B, 1)).astype(jnp.float32)
    params = init_params(k_p, D, H)

    packed = pack_params(params)    # packed once; reuse across calls
    forward = jax.jit(censor_net_forward)

    nll_loss = forward(x, gt, packed)
    jax.block_until_ready(nll_loss)
    print("KERNEL_OK")
</pallas_src>

<mosaic_0001>
module attributes {stable_mosaic.version = 11 : i64} {
  func.func @censor_net_kernel(%arg0: memref<56x16xf32, #tpu.memory_space<vmem>>, %arg1: memref<7x8xf32, #tpu.memory_space<vmem>>, %arg2: memref<16x96xf32, #tpu.memory_space<vmem>>, %arg3: memref<32x96xf32, #tpu.memory_space<vmem>>, %arg4: memref<2x96xf32, #tpu.memory_space<vmem>>, %arg5: memref<1x33xf32, #tpu.memory_space<vmem>>, %arg6: memref<1x1xf32, #tpu.memory_space<vmem>>, %arg7: memref<7x8x32xf32, #tpu.memory_space<vmem>>) attributes {dimension_semantics = [], scalar_prefetch = 0 : i64, scratch_operands = 1 : i64, tpu.core_type = #tpu.core_type<tc>} {
    %c0 = arith.constant 0 : index
    %c0_0 = arith.constant 0 : index
    %0 = vector.load %arg0[%c0, %c0_0] : memref<56x16xf32, #tpu.memory_space<vmem>>, vector<56x16xf32>
    %c0_1 = arith.constant 0 : index
    %c0_2 = arith.constant 0 : index
    %1 = vector.load %arg2[%c0_1, %c0_2] : memref<16x96xf32, #tpu.memory_space<vmem>>, vector<16x96xf32>
    %cst = arith.constant dense<0.000000e+00> : vector<56x96xf32>
    %2 = tpu.matmul %0, %1, %cst {dimension_numbers = #tpu.dot_dimension_numbers<[1], [0], [0], [1], [0, 0, 1, 1], [], []>} : vector<56x16xf32>, vector<16x96xf32>, vector<56x96xf32> -> vector<56x96xf32>
    %c0_3 = arith.constant 0 : index
    %c0_4 = arith.constant 0 : index
    %3 = vector.load %arg4[%c0_3, %c0_4] : memref<2x96xf32, #tpu.memory_space<vmem>>, vector<1x96xf32>
    %4 = vector.broadcast %3 : vector<1x96xf32> to vector<56x96xf32>
    %5 = arith.addf %2, %4 : vector<56x96xf32>
    %c0_5 = arith.constant 0 : index
    %c0_6 = arith.constant 0 : index
    %6 = vector.load %arg3[%c0_5, %c0_6] : memref<32x96xf32, #tpu.memory_space<vmem>>, vector<32x96xf32>
    %c1 = arith.constant 1 : index
    %c0_7 = arith.constant 0 : index
    %7 = vector.load %arg4[%c1, %c0_7] : memref<2x96xf32, #tpu.memory_space<vmem>>, vector<1x32xf32>
    %cst_8 = arith.constant 0.000000e+00 : f32
    %8 = vector.broadcast %cst_8 : f32 to vector<8x32xf32>
    %cst_9 = arith.constant dense<0.000000e+00> : vector<8x96xf32>
    %9 = tpu.matmul %8, %6, %cst_9 {dimension_numbers = #tpu.dot_dimension_numbers<[1], [0], [0], [1], [0, 0, 1, 1], [], []>} : vector<8x32xf32>, vector<32x96xf32>, vector<8x96xf32> -> vector<8x96xf32>
    %10 = vector.extract_strided_slice %5 {offsets = [0, 0], sizes = [8, 96], strides = [1, 1]} : vector<56x96xf32> to vector<8x96xf32>
    %11 = vector.extract_strided_slice %10 {offsets = [0, 0], sizes = [8, 64], strides = [1, 1]} : vector<8x96xf32> to vector<8x64xf32>
    %12 = vector.extract_strided_slice %9 {offsets = [0, 0], sizes = [8, 64], strides = [1, 1]} : vector<8x96xf32> to vector<8x64xf32>
    %13 = arith.addf %11, %12 : vector<8x64xf32>
    %14 = arith.negf %13 : vector<8x64xf32>
    %15 = math.exp %14 : vector<8x64xf32>
    %cst_10 = arith.constant 1.000000e+00 : f32
    %16 = vector.broadcast %cst_10 : f32 to vector<8x64xf32>
    %17 = arith.addf %16, %15 : vector<8x64xf32>
    %18 = arith.divf %16, %17 : vector<8x64xf32>
    %19 = vector.extract_strided_slice %18 {offsets = [0, 0], sizes = [8, 32], strides = [1, 1]} : vector<8x64xf32> to vector<8x32xf32>
    %20 = vector.extract_strided_slice %18 {offsets = [0, 32], sizes = [8, 32], strides = [1, 1]} : vector<8x64xf32> to vector<8x32xf32>
    %21 = vector.extract_strided_slice %10 {offsets = [0, 64], sizes = [8, 32], strides = [1, 1]} : vector<8x96xf32> to vector<8x32xf32>
    %22 = vector.extract_strided_slice %9 {offsets = [0, 64], sizes = [8, 32], strides = [1, 1]} : vector<8x96xf32> to vector<8x32xf32>
    %23 = vector.broadcast %7 : vector<1x32xf32> to vector<8x32xf32>
    %24 = arith.addf %22, %23 : vector<8x32xf32>
    %25 = arith.mulf %19, %24 : vector<8x32xf32>
    %26 = arith.addf %21, %25 : vector<8x32xf32>
    %27 = math.tanh %26 : vector<8x32xf32>
    %cst_11 = arith.constant 1.000000e+00 : f32
    %28 = vector.broadcast %cst_11 : f32 to vector<8x32xf32>
    %29 = arith.subf %28, %20 : vector<8x32xf32>
    %30 = arith.mulf %29, %27 : vector<8x32xf32>
    %31 = arith.mulf %20, %8 : vector<8x32xf32>
    %32 = arith.addf %30, %31 : vector<8x32xf32>
    %c0_12 = arith.constant 0 : index
    %c0_13 = arith.constant 0 : index
    %c0_14 = arith.constant 0 : index
    %33 = vector.load %arg7[%c0_12, %c0_13, %c0_14] : memref<7x8x32xf32, #tpu.memory_space<vmem>>, vector<1x8x32xf32>
    %34 = vector.shape_cast %33 : vector<1x8x32xf32> to vector<8x32xf32>
    %35 = vector.shape_cast %32 : vector<8x32xf32> to vector<1x8x32xf32>
    tpu.vector_store %arg7[%c0_12, %c0_13, %c0_14], %35 {strides = array<i32>} : memref<7x8x32xf32, #tpu.memory_space<vmem>>, vector<1x8x32xf32>,
    %cst_15 = arith.constant dense<0.000000e+00> : vector<8x96xf32>
    %36 = tpu.matmul %32, %6, %cst_15 {dimension_numbers = #tpu.dot_dimension_numbers<[1], [0], [0], [1], [0, 0, 1, 1], [], []>} : vector<8x32xf32>, vector<32x96xf32>, vector<8x96xf32> -> vector<8x96xf32>
    %37 = vector.extract_strided_slice %5 {offsets = [8, 0], sizes = [8, 96], strides = [1, 1]} : vector<56x96xf32> to vector<8x96xf32>
    %38 = vector.extract_strided_slice %37 {offsets = [0, 0], sizes = [8, 64], strides = [1, 1]} : vector<8x96xf32> to vector<8x64xf32>
    %39 = vector.extract_strided_slice %36 {offsets = [0, 0], sizes = [8, 64], strides = [1, 1]} : vector<8x96xf32> to vector<8x64xf32>
    %40 = arith.addf %38, %39 : vector<8x64xf32>
    %41 = arith.negf %40 : vector<8x64xf32>
    %42 = math.exp %41 : vector<8x64xf32>
    %cst_16 = arith.constant 1.000000e+00 : f32
    %43 = vector.broadcast %cst_16 : f32 to vector<8x64xf32>
    %44 = arith.addf %43, %42 : vector<8x64xf32>
    %45 = arith.divf %43, %44 : vector<8x64xf32>
    %46 = vector.extract_strided_slice %45 {offsets = [0, 0], sizes = [8, 32], strides = [1, 1]} : vector<8x64xf32> to vector<8x32xf32>
    %47 = vector.extract_strided_slice %45 {offsets = [0, 32], sizes = [8, 32], strides = [1, 1]} : vector<8x64xf32> to vector<8x32xf32>
    %48 = vector.extract_strided_slice %37 {offsets = [0, 64], sizes = [8, 32], strides = [1, 1]} : vector<8x96xf32> to vector<8x32xf32>
    %49 = vector.extract_strided_slice %36 {offsets = [0, 64], sizes = [8, 32], strides = [1, 1]} : vector<8x96xf32> to vector<8x32xf32>
    %50 = vector.broadcast %7 : vector<1x32xf32> to vector<8x32xf32>
    %51 = arith.addf %49, %50 : vector<8x32xf32>
    %52 = arith.mulf %46, %51 : vector<8x32xf32>
    %53 = arith.addf %48, %52 : vector<8x32xf32>
    %54 = math.tanh %53 : vector<8x32xf32>
    %cst_17 = arith.constant 1.000000e+00 : f32
    %55 = vector.broadcast %cst_17 : f32 to vector<8x32xf32>
    %56 = arith.subf %55, %47 : vector<8x32xf32>
    %57 = arith.mulf %56, %54 : vector<8x32xf32>
    %58 = arith.mulf %47, %32 : vector<8x32xf32>
    %59 = arith.addf %57, %58 : vector<8x32xf32>
    %c1_18 = arith.constant 1 : index
    %c0_19 = arith.constant 0 : index
    %c0_20 = arith.constant 0 : index
    %60 = vector.load %arg7[%c1_18, %c0_19, %c0_20] : memref<7x8x32xf32, #tpu.memory_space<vmem>>, vector<1x8x32xf32>
    %61 = vector.shape_cast %60 : vector<1x8x32xf32> to vector<8x32xf32>
    %62 = vector.shape_cast %59 : vector<8x32xf32> to vector<1x8x32xf32>
    tpu.vector_store %arg7[%c1_18, %c0_19, %c0_20], %62 {strides = array<i32>} : memref<7x8x32xf32, #tpu.memory_space<vmem>>, vector<1x8x32xf32>,
    %cst_21 = arith.constant dense<0.000000e+00> : vector<8x96xf32>
    %63 = tpu.matmul %59, %6, %cst_21 {dimension_numbers = #tpu.dot_dimension_numbers<[1], [0], [0], [1], [0, 0, 1, 1], [], []>} : vector<8x32xf32>, vector<32x96xf32>, vector<8x96xf32> -> vector<8x96xf32>
    %64 = vector.extract_strided_slice %5 {offsets = [16, 0], sizes = [8, 96], strides = [1, 1]} : vector<56x96xf32> to vector<8x96xf32>
    %65 = vector.extract_strided_slice %64 {offsets = [0, 0], sizes = [8, 64], strides = [1, 1]} : vector<8x96xf32> to vector<8x64xf32>
    %66 = vector.extract_strided_slice %63 {offsets = [0, 0], sizes = [8, 64], strides = [1, 1]} : vector<8x96xf32> to vector<8x64xf32>
    %67 = arith.addf %65, %66 : vector<8x64xf32>
    %68 = arith.negf %67 : vector<8x64xf32>
    %69 = math.exp %68 : vector<8x64xf32>
    %cst_22 = arith.constant 1.000000e+00 : f32
    %70 = vector.broadcast %cst_22 : f32 to vector<8x64xf32>
    %71 = arith.addf %70, %69 : vector<8x64xf32>
    %72 = arith.divf %70, %71 : vector<8x64xf32>
    %73 = vector.extract_strided_slice %72 {offsets = [0, 0], sizes = [8, 32], strides = [1, 1]} : vector<8x64xf32> to vector<8x32xf32>
    %74 = vector.extract_strided_slice %72 {offsets = [0, 32], sizes = [8, 32], strides = [1, 1]} : vector<8x64xf32> to vector<8x32xf32>
    %75 = vector.extract_strided_slice %64 {offsets = [0, 64], sizes = [8, 32], strides = [1, 1]} : vector<8x96xf32> to vector<8x32xf32>
    %76 = vector.extract_strided_slice %63 {offsets = [0, 64], sizes = [8, 32], strides = [1, 1]} : vector<8x96xf32> to vector<8x32xf32>
    %77 = vector.broadcast %7 : vector<1x32xf32> to vector<8x32xf32>
    %78 = arith.addf %76, %77 : vector<8x32xf32>
    %79 = arith.mulf %73, %78 : vector<8x32xf32>
    %80 = arith.addf %75, %79 : vector<8x32xf32>
    %81 = math.tanh %80 : vector<8x32xf32>
    %cst_23 = arith.constant 1.000000e+00 : f32
    %82 = vector.broadcast %cst_23 : f32 to vector<8x32xf32>
    %83 = arith.subf %82, %74 : vector<8x32xf32>
    %84 = arith.mulf %83, %81 : vector<8x32xf32>
    %85 = arith.mulf %74, %59 : vector<8x32xf32>
    %86 = arith.addf %84, %85 : vector<8x32xf32>
    %c2 = arith.constant 2 : index
    %c0_24 = arith.constant 0 : index
    %c0_25 = arith.constant 0 : index
    %87 = vector.load %arg7[%c2, %c0_24, %c0_25] : memref<7x8x32xf32, #tpu.memory_space<vmem>>, vector<1x8x32xf32>
    %88 = vector.shape_cast %87 : vector<1x8x32xf32> to vector<8x32xf32>
    %89 = vector.shape_cast %86 : vector<8x32xf32> to vector<1x8x32xf32>
    tpu.vector_store %arg7[%c2, %c0_24, %c0_25], %89 {strides = array<i32>} : memref<7x8x32xf32, #tpu.memory_space<vmem>>, vector<1x8x32xf32>,
    %cst_26 = arith.constant dense<0.000000e+00> : vector<8x96xf32>
    %90 = tpu.matmul %86, %6, %cst_26 {dimension_numbers = #tpu.dot_dimension_numbers<[1], [0], [0], [1], [0, 0, 1, 1], [], []>} : vector<8x32xf32>, vector<32x96xf32>, vector<8x96xf32> -> vector<8x96xf32>
    %91 = vector.extract_strided_slice %5 {offsets = [24, 0], sizes = [8, 96], strides = [1, 1]} : vector<56x96xf32> to vector<8x96xf32>
    %92 = vector.extract_strided_slice %91 {offsets = [0, 0], sizes = [8, 64], strides = [1, 1]} : vector<8x96xf32> to vector<8x64xf32>
    %93 = vector.extract_strided_slice %90 {offsets = [0, 0], sizes = [8, 64], strides = [1, 1]} : vector<8x96xf32> to vector<8x64xf32>
    %94 = arith.addf %92, %93 : vector<8x64xf32>
    %95 = arith.negf %94 : vector<8x64xf32>
    %96 = math.exp %95 : vector<8x64xf32>
    %cst_27 = arith.constant 1.000000e+00 : f32
    %97 = vector.broadcast %cst_27 : f32 to vector<8x64xf32>
    %98 = arith.addf %97, %96 : vector<8x64xf32>
    %99 = arith.divf %97, %98 : vector<8x64xf32>
    %100 = vector.extract_strided_slice %99 {offsets = [0, 0], sizes = [8, 32], strides = [1, 1]} : vector<8x64xf32> to vector<8x32xf32>
    %101 = vector.extract_strided_slice %99 {offsets = [0, 32], sizes = [8, 32], strides = [1, 1]} : vector<8x64xf32> to vector<8x32xf32>
    %102 = vector.extract_strided_slice %91 {offsets = [0, 64], sizes = [8, 32], strides = [1, 1]} : vector<8x96xf32> to vector<8x32xf32>
    %103 = vector.extract_strided_slice %90 {offsets = [0, 64], sizes = [8, 32], strides = [1, 1]} : vector<8x96xf32> to vector<8x32xf32>
    %104 = vector.broadcast %7 : vector<1x32xf32> to vector<8x32xf32>
    %105 = arith.addf %103, %104 : vector<8x32xf32>
    %106 = arith.mulf %100, %105 : vector<8x32xf32>
    %107 = arith.addf %102, %106 : vector<8x32xf32>
    %108 = math.tanh %107 : vector<8x32xf32>
    %cst_28 = arith.constant 1.000000e+00 : f32
    %109 = vector.broadcast %cst_28 : f32 to vector<8x32xf32>
    %110 = arith.subf %109, %101 : vector<8x32xf32>
    %111 = arith.mulf %110, %108 : vector<8x32xf32>
    %112 = arith.mulf %101, %86 : vector<8x32xf32>
    %113 = arith.addf %111, %112 : vector<8x32xf32>
    %c3 = arith.constant 3 : index
    %c0_29 = arith.constant 0 : index
    %c0_30 = arith.constant 0 : index
    %114 = vector.load %arg7[%c3, %c0_29, %c0_30] : memref<7x8x32xf32, #tpu.memory_space<vmem>>, vector<1x8x32xf32>
    %115 = vector.shape_cast %114 : vector<1x8x32xf32> to vector<8x32xf32>
    %116 = vector.shape_cast %113 : vector<8x32xf32> to vector<1x8x32xf32>
    tpu.vector_store %arg7[%c3, %c0_29, %c0_30], %116 {strides = array<i32>} : memref<7x8x32xf32, #tpu.memory_space<vmem>>, vector<1x8x32xf32>,
    %cst_31 = arith.constant dense<0.000000e+00> : vector<8x96xf32>
    %117 = tpu.matmul %113, %6, %cst_31 {dimension_numbers = #tpu.dot_dimension_numbers<[1], [0], [0], [1], [0, 0, 1, 1], [], []>} : vector<8x32xf32>, vector<32x96xf32>, vector<8x96xf32> -> vector<8x96xf32>
    %118 = vector.extract_strided_slice %5 {offsets = [32, 0], sizes = [8, 96], strides = [1, 1]} : vector<56x96xf32> to vector<8x96xf32>
    %119 = vector.extract_strided_slice %118 {offsets = [0, 0], sizes = [8, 64], strides = [1, 1]} : vector<8x96xf32> to vector<8x64xf32>
    %120 = vector.extract_strided_slice %117 {offsets = [0, 0], sizes = [8, 64], strides = [1, 1]} : vector<8x96xf32> to vector<8x64xf32>
    %121 = arith.addf %119, %120 : vector<8x64xf32>
    %122 = arith.negf %121 : vector<8x64xf32>
    %123 = math.exp %122 : vector<8x64xf32>
    %cst_32 = arith.constant 1.000000e+00 : f32
    %124 = vector.broadcast %cst_32 : f32 to vector<8x64xf32>
    %125 = arith.addf %124, %123 : vector<8x64xf32>
    %126 = arith.divf %124, %125 : vector<8x64xf32>
    %127 = vector.extract_strided_slice %126 {offsets = [0, 0], sizes = [8, 32], strides = [1, 1]} : vector<8x64xf32> to vector<8x32xf32>
    %128 = vector.extract_strided_slice %126 {offsets = [0, 32], sizes = [8, 32], strides = [1, 1]} : vector<8x64xf32> to vector<8x32xf32>
    %129 = vector.extract_strided_slice %118 {offsets = [0, 64], sizes = [8, 32], strides = [1, 1]} : vector<8x96xf32> to vector<8x32xf32>
    %130 = vector.extract_strided_slice %117 {offsets = [0, 64], sizes = [8, 32], strides = [1, 1]} : vector<8x96xf32> to vector<8x32xf32>
    %131 = vector.broadcast %7 : vector<1x32xf32> to vector<8x32xf32>
    %132 = arith.addf %130, %131 : vector<8x32xf32>
    %133 = arith.mulf %127, %132 : vector<8x32xf32>
    %134 = arith.addf %129, %133 : vector<8x32xf32>
    %135 = math.tanh %134 : vector<8x32xf32>
    %cst_33 = arith.constant 1.000000e+00 : f32
    %136 = vector.broadcast %cst_33 : f32 to vector<8x32xf32>
    %137 = arith.subf %136, %128 : vector<8x32xf32>
    %138 = arith.mulf %137, %135 : vector<8x32xf32>
    %139 = arith.mulf %128, %113 : vector<8x32xf32>
    %140 = arith.addf %138, %139 : vector<8x32xf32>
    %c4 = arith.constant 4 : index
    %c0_34 = arith.constant 0 : index
    %c0_35 = arith.constant 0 : index
    %141 = vector.load %arg7[%c4, %c0_34, %c0_35] : memref<7x8x32xf32, #tpu.memory_space<vmem>>, vector<1x8x32xf32>
    %142 = vector.shape_cast %141 : vector<1x8x32xf32> to vector<8x32xf32>
    %143 = vector.shape_cast %140 : vector<8x32xf32> to vector<1x8x32xf32>
    tpu.vector_store %arg7[%c4, %c0_34, %c0_35], %143 {strides = array<i32>} : memref<7x8x32xf32, #tpu.memory_space<vmem>>, vector<1x8x32xf32>,
    %cst_36 = arith.constant dense<0.000000e+00> : vector<8x96xf32>
    %144 = tpu.matmul %140, %6, %cst_36 {dimension_numbers = #tpu.dot_dimension_numbers<[1], [0], [0], [1], [0, 0, 1, 1], [], []>} : vector<8x32xf32>, vector<32x96xf32>, vector<8x96xf32> -> vector<8x96xf32>
    %145 = vector.extract_strided_slice %5 {offsets = [40, 0], sizes = [8, 96], strides = [1, 1]} : vector<56x96xf32> to vector<8x96xf32>
    %146 = vector.extract_strided_slice %145 {offsets = [0, 0], sizes = [8, 64], strides = [1, 1]} : vector<8x96xf32> to vector<8x64xf32>
    %147 = vector.extract_strided_slice %144 {offsets = [0, 0], sizes = [8, 64], strides = [1, 1]} : vector<8x96xf32> to vector<8x64xf32>
    %148 = arith.addf %146, %147 : vector<8x64xf32>
    %149 = arith.negf %148 : vector<8x64xf32>
    %150 = math.exp %149 : vector<8x64xf32>
    %cst_37 = arith.constant 1.000000e+00 : f32
    %151 = vector.broadcast %cst_37 : f32 to vector<8x64xf32>
    %152 = arith.addf %151, %150 : vector<8x64xf32>
    %153 = arith.divf %151, %152 : vector<8x64xf32>
    %154 = vector.extract_strided_slice %153 {offsets = [0, 0], sizes = [8, 32], strides = [1, 1]} : vector<8x64xf32> to vector<8x32xf32>
    %155 = vector.extract_strided_slice %153 {offsets = [0, 32], sizes = [8, 32], strides = [1, 1]} : vector<8x64xf32> to vector<8x32xf32>
    %156 = vector.extract_strided_slice %145 {offsets = [0, 64], sizes = [8, 32], strides = [1, 1]} : vector<8x96xf32> to vector<8x32xf32>
    %157 = vector.extract_strided_slice %144 {offsets = [0, 64], sizes = [8, 32], strides = [1, 1]} : vector<8x96xf32> to vector<8x32xf32>
    %158 = vector.broadcast %7 : vector<1x32xf32> to vector<8x32xf32>
    %159 = arith.addf %157, %158 : vector<8x32xf32>
    %160 = arith.mulf %154, %159 : vector<8x32xf32>
    %161 = arith.addf %156, %160 : vector<8x32xf32>
    %162 = math.tanh %161 : vector<8x32xf32>
    %cst_38 = arith.constant 1.000000e+00 : f32
    %163 = vector.broadcast %cst_38 : f32 to vector<8x32xf32>
    %164 = arith.subf %163, %155 : vector<8x32xf32>
    %165 = arith.mulf %164, %162 : vector<8x32xf32>
    %166 = arith.mulf %155, %140 : vector<8x32xf32>
    %167 = arith.addf %165, %166 : vector<8x32xf32>
    %c5 = arith.constant 5 : index
    %c0_39 = arith.constant 0 : index
    %c0_40 = arith.constant 0 : index
    %168 = vector.load %arg7[%c5, %c0_39, %c0_40] : memref<7x8x32xf32, #tpu.memory_space<vmem>>, vector<1x8x32xf32>
    %169 = vector.shape_cast %168 : vector<1x8x32xf32> to vector<8x32xf32>
    %170 = vector.shape_cast %167 : vector<8x32xf32> to vector<1x8x32xf32>
    tpu.vector_store %arg7[%c5, %c0_39, %c0_40], %170 {strides = array<i32>} : memref<7x8x32xf32, #tpu.memory_space<vmem>>, vector<1x8x32xf32>,
    %cst_41 = arith.constant dense<0.000000e+00> : vector<8x96xf32>
    %171 = tpu.matmul %167, %6, %cst_41 {dimension_numbers = #tpu.dot_dimension_numbers<[1], [0], [0], [1], [0, 0, 1, 1], [], []>} : vector<8x32xf32>, vector<32x96xf32>, vector<8x96xf32> -> vector<8x96xf32>
    %172 = vector.extract_strided_slice %5 {offsets = [48, 0], sizes = [8, 96], strides = [1, 1]} : vector<56x96xf32> to vector<8x96xf32>
    %173 = vector.extract_strided_slice %172 {offsets = [0, 0], sizes = [8, 64], strides = [1, 1]} : vector<8x96xf32> to vector<8x64xf32>
    %174 = vector.extract_strided_slice %171 {offsets = [0, 0], sizes = [8, 64], strides = [1, 1]} : vector<8x96xf32> to vector<8x64xf32>
    %175 = arith.addf %173, %174 : vector<8x64xf32>
    %176 = arith.negf %175 : vector<8x64xf32>
    %177 = math.exp %176 : vector<8x64xf32>
    %cst_42 = arith.constant 1.000000e+00 : f32
    %178 = vector.broadcast %cst_42 : f32 to vector<8x64xf32>
    %179 = arith.addf %178, %177 : vector<8x64xf32>
    %180 = arith.divf %178, %179 : vector<8x64xf32>
    %181 = vector.extract_strided_slice %180 {offsets = [0, 0], sizes = [8, 32], strides = [1, 1]} : vector<8x64xf32> to vector<8x32xf32>
    %182 = vector.extract_strided_slice %180 {offsets = [0, 32], sizes = [8, 32], strides = [1, 1]} : vector<8x64xf32> to vector<8x32xf32>
    %183 = vector.extract_strided_slice %172 {offsets = [0, 64], sizes = [8, 32], strides = [1, 1]} : vector<8x96xf32> to vector<8x32xf32>
    %184 = vector.extract_strided_slice %171 {offsets = [0, 64], sizes = [8, 32], strides = [1, 1]} : vector<8x96xf32> to vector<8x32xf32>
    %185 = vector.broadcast %7 : vector<1x32xf32> to vector<8x32xf32>
    %186 = arith.addf %184, %185 : vector<8x32xf32>
    %187 = arith.mulf %181, %186 : vector<8x32xf32>
    %188 = arith.addf %183, %187 : vector<8x32xf32>
    %189 = math.tanh %188 : vector<8x32xf32>
    %cst_43 = arith.constant 1.000000e+00 : f32
    %190 = vector.broadcast %cst_43 : f32 to vector<8x32xf32>
    %191 = arith.subf %190, %182 : vector<8x32xf32>
    %192 = arith.mulf %191, %189 : vector<8x32xf32>
    %193 = arith.mulf %182, %167 : vector<8x32xf32>
    %194 = arith.addf %192, %193 : vector<8x32xf32>
    %c6 = arith.constant 6 : index
    %c0_44 = arith.constant 0 : index
    %c0_45 = arith.constant 0 : index
    %195 = vector.load %arg7[%c6, %c0_44, %c0_45] : memref<7x8x32xf32, #tpu.memory_space<vmem>>, vector<1x8x32xf32>
    %196 = vector.shape_cast %195 : vector<1x8x32xf32> to vector<8x32xf32>
    %197 = vector.shape_cast %194 : vector<8x32xf32> to vector<1x8x32xf32>
    tpu.vector_store %arg7[%c6, %c0_44, %c0_45], %197 {strides = array<i32>} : memref<7x8x32xf32, #tpu.memory_space<vmem>>, vector<1x8x32xf32>,
    %c0_46 = arith.constant 0 : index
    %c0_47 = arith.constant 0 : index
    %c0_48 = arith.constant 0 : index
    %198 = vector.load %arg7[%c0_46, %c0_47, %c0_48] : memref<7x8x32xf32, #tpu.memory_space<vmem>>, vector<7x8x32xf32>
    %c0_49 = arith.constant 0 : index
    %c0_50 = arith.constant 0 : index
    %199 = vector.load %arg5[%c0_49, %c0_50] : memref<1x33xf32, #tpu.memory_space<vmem>>, vector<1x32xf32>
    %c0_51 = arith.constant 0 : index
    %c32 = arith.constant 32 : index
    %200 = vector.load %arg5[%c0_51, %c32] : memref<1x33xf32, #tpu.memory_space<vmem>>, vector<1x1xf32>
    %201 = vector.shape_cast %199 : vector<1x32xf32> to vector<1x1x32xf32>
    %202 = vector.broadcast %201 : vector<1x1x32xf32> to vector<7x8x32xf32>
    %203 = arith.mulf %198, %202 : vector<7x8x32xf32>
    %cst_52 = arith.constant dense<0.000000e+00> : vector<7x8xf32>
    %204 = vector.multi_reduction <add>, %203, %cst_52 [2] : vector<7x8x32xf32> to vector<7x8xf32>
    %205 = vector.broadcast %200 : vector<1x1xf32> to vector<7x8xf32>
    %206 = arith.addf %204, %205 : vector<7x8xf32>
    %207 = arith.negf %206 : vector<7x8xf32>
    %208 = math.exp %207 : vector<7x8xf32>
    %cst_53 = arith.constant 1.000000e+00 : f32
    %209 = vector.broadcast %cst_53 : f32 to vector<7x8xf32>
    %210 = arith.addf %209, %208 : vector<7x8xf32>
    %211 = arith.divf %209, %210 : vector<7x8xf32>
    %c0_54 = arith.constant 0 : index
    %c0_55 = arith.constant 0 : index
    %212 = vector.load %arg1[%c0_54, %c0_55] : memref<7x8xf32, #tpu.memory_space<vmem>>, vector<7x8xf32>
    %213 = math.log %211 : vector<7x8xf32>
    %cst_56 = arith.constant -1.000000e+02 : f32
    %214 = vector.broadcast %cst_56 : f32 to vector<7x8xf32>
    %215 = arith.maximumf %213, %214 : vector<7x8xf32>
    %cst_57 = arith.constant 1.000000e+00 : f32
    %216 = vector.broadcast %cst_57 : f32 to vector<7x8xf32>
    %217 = arith.subf %216, %211 : vector<7x8xf32>
    %218 = math.log %217 : vector<7x8xf32>
    %cst_58 = arith.constant -1.000000e+02 : f32
    %219 = vector.broadcast %cst_58 : f32 to vector<7x8xf32>
    %220 = arith.maximumf %218, %219 : vector<7x8xf32>
    %221 = arith.mulf %212, %215 : vector<7x8xf32>
    %cst_59 = arith.constant 1.000000e+00 : f32
    %222 = vector.broadcast %cst_59 : f32 to vector<7x8xf32>
    %223 = arith.subf %222, %212 : vector<7x8xf32>
    %224 = arith.mulf %223, %220 : vector<7x8xf32>
    %225 = arith.addf %221, %224 : vector<7x8xf32>
    %cst_60 = arith.constant dense<0.000000e+00> : vector<7xf32>
    %226 = vector.multi_reduction <add>, %225, %cst_60 [1] : vector<7x8xf32> to vector<7xf32>
    %227 = vector.shape_cast %226 : vector<7xf32> to vector<7x1xf32>
    %cst_61 = arith.constant dense<0.000000e+00> : vector<1xf32>
    %228 = vector.multi_reduction <add>, %227, %cst_61 [0] : vector<7x1xf32> to vector<1xf32>
    %229 = vector.shape_cast %228 : vector<1xf32> to vector<1x1xf32>
    %cst_62 = arith.constant 0.000000e+00 : f32
    %230 = vector.broadcast %cst_62 : f32 to vector<1x1xf32>
    %231 = arith.subf %230, %229 : vector<1x1xf32>
    %c0_63 = arith.constant 0 : index
    %c0_64 = arith.constant 0 : index
    %232 = vector.load %arg6[%c0_63, %c0_64] : memref<1x1xf32, #tpu.memory_space<vmem>>, vector<1x1xf32>
    tpu.vector_store %arg6[%c0_63, %c0_64], %231 {strides = array<i32>} : memref<1x1xf32, #tpu.memory_space<vmem>>, vector<1x1xf32>,
    return
  }
}

</mosaic_0001>

<bundles_post_ra>
// kernel: censor_net_forward.1
= control target key start
LH: loop header
LB: loop body
LE: loop exit
PB: predicated region body
PF: predicated region fallthrough
CT: control target
= control target key end

     0   :  { %v1483_v2 = vmov 0.0   ;;  %vm38_vm0 = vcmask 130048   ;;  %s1761_s0 = inlined_call_operand.vmem [shape: f32[56,16], index: 0, kind: input, shape index: {}]   ;;  %s1762_s1 = inlined_call_operand.vmem [shape: f32[7,8], index: 1, kind: input, shape index: {}]   ;;  %s1763_s2 = inlined_call_operand.vmem [shape: f32[16,96], index: 2, kind: input, shape index: {}]   ;;  %s1764_s3 = inlined_call_operand.vmem [shape: f32[32,96], index: 3, kind: input, shape index: {}]   ;;  %s1765_s4 = inlined_call_operand.vmem [shape: f32[2,96], index: 4, kind: input, shape index: {}]   ;;  %s1766_s5 = inlined_call_operand.vmem [shape: f32[1,33], index: 5, kind: input, shape index: {}]   ;;  %s1767_s6 = inlined_call_operand.hbm [shape: f32[1,1], index: 6, kind: output, shape index: {}]  }
   0x1   :  { %v1527_v0 = vld [vmem:[%s1764_s3 + $0x18] sm:$0xff]  ;;  %v32_v1 = vld [vmem:[%s1763_s2 + $0x8] sm:$0xff]  ;;  %1278 = vmatprep.subr.mxu1 %v1483_v2  ;;  %1253 = vmatprep.subr.mxu0 %v1483_v2  ;;  %v1537_v3 = vld [vmem:[%s1764_s3 + $0x10] sm:$0xff] }
   0x2   :  { %v31_v4 = vld [vmem:[%s1763_s2] sm:$0xff]  ;;  %1279 = vmatpush3.msra.mxu1 %v1527_v0  ;;  %1254 = vmatpush3.msra.mxu0 %v32_v1  ;;  %v1548_v5 = vld [vmem:[%s1764_s3 + $0x8] sm:$0xff] }
   0x3   :  { %1280 = vmatprep.subr.mxu1 %v1483_v2  ;;  %1255 = vmatprep.subr.mxu0 %v1483_v2  ;;  %v24_v6 = vld [vmem:[%s1761_s0] sm:$0xff] }
   0x4   :  { %11 = vsyncpa [#allocation4], 0  ;;  %1281 = vmatpush3.msra.mxu1 %v1537_v3  ;;  %1256 = vmatpush3.msra.mxu0 %v31_v4  ;;  %vm1484_vm1 = vmmov 0   ;;  %v1560_v7 = vld [vmem:[%s1764_s3] sm:$0xff]  ;;  %s1485_s12 = smov 64   ;;  %v25_v26 = vld [vmem:[%s1761_s0 + $0x8] sm:$0xff] }
   0x5   :  { %1282 = vmatprep.subr.mxu1 %v1483_v2  ;;  %1257 = vmatprep.mubr.msk.f32.mxu0 %vm1484_vm1, %v1483_v2  ;;  %v1188_v8 = vld [vmem:[%s1765_s4 + $0x1] ss:$0 sm:$0xff]  ;;  %v1602_v15 = vld [vmem:[%s1765_s4] ss:$0 sm:$0xff]  ;;  %s1486_s4 = smov 96   ;;  %vm165_vm2 = vcmask 261120  }
   0x6   :  { %1283 = vmatpush3.msra.mxu1 %v1548_v5  ;;  %1258 = vmatmul.mubr.msk.f32.vlgmr.msra.gmra.mxu0 %vm38_vm0, %v24_v6  ;;  %v26_v49 = vld [vmem:[%s1761_s0 + $0x10] sm:$0xff]  ;;  %vm1091_vm3 = vcmask 1041409   ;;  %vm1093_vm4 = vcmask 1042434   ;;  %vm1095_vm5 = vcmask 1043459   ;;  %vm1097_vm6 = vcmask 1044484  }
   0x7   :  { %1284 = vmatprep.subr.mxu1 %v1483_v2  ;;  %1286 = vmatprep.mubr.msk.f32.mxu1 %vm1484_vm1, %v1483_v2  ;;  %vm1099_vm7 = vcmask 1045509   ;;  %vm1101_vm8 = vcmask 1046534   ;;  %vm1150_vm9 = vcmask 63488   ;;  %vm1154_vm10 = vcmask 1046528  }
   0x8   :  { %1285 = vmatpush3.msra.mxu1 %v1560_v7  ;;  %251 = vrot.lane.b32.xlu0 %v1188_v8, %s1485_s12  ;;  %vm1163_vm11 = vcmask 0  }
   0x9   :  { %1287 = vmatmul.mubr.f32.vlgmr.msra.gmra.mxu1 %v1483_v2  ;;  %1289 = vmatprep.subr.mxu1 %v1483_v2 }
   0xa   :  { %1290 = vmatpush3.msra.mxu1 %v1527_v0  ;;  %1260 = vmatprep.mubr.msk.f32.mxu0 %vm1484_vm1, %v1483_v2 }
   0xb   :  { %1291 = vmatprep.subr.mxu1 %v1483_v2  ;;  %1297 = vmatprep.mubr.msk.f32.mxu1 %vm1484_vm1, %v1483_v2 }
   0xc   :  { %1292 = vmatpush3.msra.mxu1 %v1537_v3  ;;  %1311 = vmatprep.subr.mxu0 %v1483_v2 }
   0xd   :  { %1293 = vmatprep.subr.mxu1 %v1483_v2  ;;  %1312 = vmatpush3.msra.mxu0 %v1527_v0 }
   0xe   :  { %1294 = vmatpush3.msra.mxu1 %v1548_v5  ;;  %1313 = vmatprep.subr.mxu0 %v1483_v2 }
   0xf   :  { %1295 = vmatprep.subr.mxu1 %v1483_v2  ;;  %1314 = vmatpush3.msra.mxu0 %v1537_v3 }
  0x10   :  { %1296 = vmatpush3.msra.mxu1 %v1560_v7  ;;  %1315 = vmatprep.subr.mxu0 %v1483_v2 }
  0x11   :  { %1300 = vmatprep.subr.mxu1 %v1483_v2  ;;  %1316 = vmatpush3.msra.mxu0 %v1548_v5 }
  0x12   :  { %1317 = vmatprep.subr.mxu0 %v1483_v2  ;;  %1261 = vmatmul.mubr.msk.f32.gmra.mxu0 %vm38_vm0, %v25_v26 }
  0x13   :  { %1318 = vmatpush3.msra.mxu0 %v1560_v7  ;;  %1263 = vmatprep.mubr.msk.f32.mxu0 %vm1484_vm1, %v1483_v2 }
  0x14   :  { %1333 = vmatprep.subr.mxu0 %v1483_v2 }
  0x16   :  { %1264 = vmatmul.mubr.msk.f32.gmra.mxu0 %vm38_vm0, %v26_v49 }
  0x17   :  { %1266 = vmatprep.mubr.msk.f32.mxu0 %vm1484_vm1, %v1483_v2 }
  0x7a   :  { %v1595_v10 = vpop.permute.xlu0 %251 }
  0xc6   :  { %v126_v9 = vpop.f32.mrf.mxu0 }
  0xc7   :  { %v127_v16 = vadd.f32 %v1602_v15, %v126_v9 }
  0xc8   :  { %v1259_v11 = vpop.f32.mrf.mxu0 }
  0xc9   :  { %v235_v12 = vpop.f32.mrf.mxu1 }
  0xca   :  { %v254_v13 = vadd.f32 %v1595_v10, %v235_v12  ;;  %v239_v17 = vadd.f32 %v235_v12, %v127_v16 }
  0xcb   :  { %v1288_v14 = vpop.f32.mrf.mxu1 }
  0xcc   :  { %256 = vrot.lane.b32.xlu0 %v254_v13, %s1485_s12  ;;  %v1187_v18 = vmul.f32 -1.442695, %v239_v17  ;;  %v27_v14 = vld [vmem:[%s1761_s0 + $0x18] sm:$0xff]  ;;  %v29_v17 = vld [vmem:[%s1761_s0 + $0x28] sm:$0xff] }
  0xcd   :  { %1267 = vmatmul.mubr.msk.f32.gmra.mxu0 %vm38_vm0, %v27_v14 }
  0xce   :  { %1363 = vpow2.f32 %v1187_v18  ;;  %1269 = vmatprep.mubr.msk.f32.mxu0 %vm1484_vm1, %v1483_v2 }
  0xd2   :  { %v131_v33 = vpop.f32.mrf.mxu0 }
  0xd3   :  { %v132_v39 = vadd.f32 %v1602_v15, %v131_v33 }
  0xd4   :  { %v1262_v34 = vpop.f32.mrf.mxu0 }
  0xd6   :  { %v136_v56 = vpop.f32.mrf.mxu0 }
  0xd7   :  { %v137_v62 = vadd.f32 %v1602_v15, %v136_v56 }
  0xd8   :  { %v1265_v57 = vpop.f32.mrf.mxu0 }
  0xdb   :  { %v1364_v19 = vpop.eup %1363 }
  0xdc   :  { %v243_v20 = vadd.f32 1.0, %v1364_v19  ;;  %v30_v19 = vld [vmem:[%s1761_s0 + $0x30] sm:$0xff] }
  0xde   :  { %1365 = vrcp.f32 %v243_v20 }
  0xeb   :  { %v1366_v21 = vpop.eup %1365 }
  0xec   :  { %v266_v28 = vsub.f32 1.0, %v1366_v21  ;;  %v272_v30 = vmul.f32 0.0, %v1366_v21 }
 0x13e   :  { %v257_v22 = vpop.permute.xlu0 %256 }
 0x13f   :  { %v259_v23 = vmul.f32 %v1366_v21, %v257_v22 }
 0x141   :  { %261 = vrot.lane.b32.xlu1 %v259_v23, %s1485_s12 }
 0x1b3   :  { %v262_v24 = vpop.permute.xlu1 %261 }
 0x1b4   :  { %v264_v25 = vadd.f32 %v262_v24, %v127_v16  ;;  %v28_v16 = vld [vmem:[%s1761_s0 + $0x20] sm:$0xff] }
 0x1b5   :  { %1270 = vmatmul.mubr.msk.f32.gmra.mxu0 %vm38_vm0, %v28_v16 }
 0x1b6   :  { %1367 = vtanh.f32 %v264_v25  ;;  %1272 = vmatprep.mubr.msk.f32.mxu0 %vm1484_vm1, %v1483_v2  ;;  %v141_v25 = vpop.f32.mrf.mxu0 }
 0x1b8   :  { %v1268_v26 = vpop.f32.mrf.mxu0 }
 0x1b9   :  { %1273 = vmatmul.mubr.msk.f32.gmra.mxu0 %vm38_vm0, %v29_v17 }
 0x1ba   :  { %1275 = vmatprep.mubr.msk.f32.mxu0 %vm1484_vm1, %v1483_v2 }
 0x1bd   :  { %1276 = vmatmul.mubr.msk.f32.gmra.mxu0 %vm38_vm0, %v30_v19 }
 0x1be   :  { %1319 = vmatprep.mubr.msk.f32.mxu0 %vm1484_vm1, %v1483_v2 }
 0x1c3   :  { %v1368_v27 = vpop.eup %1367 }
 0x1c4   :  { %268 = vrot.lane.b32.xlu1 %v1368_v27, %s1486_s4 }
 0x236   :  { %v269_v29 = vpop.permute.xlu1 %268 }
 0x237   :  { %v271_v31 = vmul.f32 %v269_v29, %v266_v28 }
 0x239   :  { %v273_v32 = vadd.f32 %v272_v30, %v271_v31 }
 0x23b   :  { %275 = vrot.lane.b32.xlu0 %v273_v32, %s1486_s4 }
 0x275   :  { %v146_v27 = vpop.f32.mrf.mxu0 }
 0x277   :  { %v1271_v28 = vpop.f32.mrf.mxu0 }
 0x279   :  { %v1680_v29 = vpop.f32.mrf.mxu0 }
 0x27a   :  { %v152_v14 = vadd.f32 %v1602_v15, %v1680_v29 }
 0x27b   :  { %v1274_v30 = vpop.f32.mrf.mxu0 }
 0x27d   :  { %v1682_v31 = vpop.f32.mrf.mxu0 }
 0x2ad   :  { %v276_v35 = vpop.permute.xlu0 %275 }
 0x2ae   :  { %278 = vst.msk [vmem:[#allocation2] sm:$0xff] %vm165_vm2, %v276_v35  ;;  %1298 = vmatmul.mubr.msk.f32.vlgmr.msra.gmra.mxu1 %vm165_vm2, %v276_v35 }
 0x2af   :  { %1301 = vmatpush3.msra.mxu1 %v1527_v0  ;;  %1308 = vmatprep.mubr.msk.f32.mxu1 %vm1484_vm1, %v1483_v2 }
 0x2b0   :  { %1302 = vmatprep.subr.mxu1 %v1483_v2 }
 0x2b1   :  { %1303 = vmatpush3.msra.mxu1 %v1537_v3 }
 0x2b2   :  { %1304 = vmatprep.subr.mxu1 %v1483_v2 }
 0x2b3   :  { %1305 = vmatpush3.msra.mxu1 %v1548_v5 }
 0x2b4   :  { %1306 = vmatprep.subr.mxu1 %v1483_v2 }
 0x2b5   :  { %1307 = vmatpush3.msra.mxu1 %v1560_v7 }
 0x2b6   :  { %1322 = vmatprep.subr.mxu1 %v1483_v2 }
 0x36e   :  { %v347_v36 = vpop.f32.mrf.mxu1 }
 0x36f   :  { %v358_v37 = vadd.f32 %v347_v36, %v1595_v10  ;;  %v351_v40 = vadd.f32 %v347_v36, %v132_v39 }
 0x370   :  { %v1299_v38 = vpop.f32.mrf.mxu1 }
 0x371   :  { %360 = vrot.lane.b32.xlu1 %v358_v37, %s1485_s12  ;;  %v1190_v41 = vmul.f32 -1.442695, %v351_v40  ;;  %v142_v37 = vadd.f32 %v1602_v15, %v141_v25 }
 0x373   :  { %1369 = vpow2.f32 %v1190_v41 }
 0x380   :  { %v1370_v42 = vpop.eup %1369 }
 0x381   :  { %v355_v43 = vadd.f32 1.0, %v1370_v42 }
 0x383   :  { %1371 = vrcp.f32 %v355_v43 }
 0x390   :  { %v1372_v44 = vpop.eup %1371 }
 0x391   :  { %v370_v51 = vsub.f32 1.0, %v1372_v44  ;;  %v376_v53 = vmul.f32 %v1372_v44, %v273_v32  ;;  %v1277_v32 = vpop.f32.mrf.mxu0 }
 0x3e3   :  { %v361_v45 = vpop.permute.xlu1 %360 }
 0x3e4   :  { %v363_v46 = vmul.f32 %v1372_v44, %v361_v45 }
 0x3e6   :  { %365 = vrot.lane.b32.xlu0 %v363_v46, %s1485_s12 }
 0x458   :  { %v366_v47 = vpop.permute.xlu0 %365 }
 0x459   :  { %v368_v48 = vadd.f32 %v366_v47, %v132_v39 }
 0x45b   :  { %1373 = vtanh.f32 %v368_v48 }
 0x468   :  { %v1374_v50 = vpop.eup %1373 }
 0x469   :  { %372 = vrot.lane.b32.xlu1 %v1374_v50, %s1486_s4 }
 0x4db   :  { %v373_v52 = vpop.permute.xlu1 %372 }
 0x4dc   :  { %v375_v54 = vmul.f32 %v373_v52, %v370_v51 }
 0x4de   :  { %v377_v55 = vadd.f32 %v376_v53, %v375_v54 }
 0x4e0   :  { %379 = vrot.lane.b32.xlu0 %v377_v55, %s1486_s4 }
 0x552   :  { %v380_v58 = vpop.permute.xlu0 %379 }
 0x553   :  { %383 = vst.msk [vmem:[#allocation2 + $0x8] sm:$0xff] %vm165_vm2, %v380_v58  ;;  %1309 = vmatmul.mubr.msk.f32.vlgmr.msra.gmra.mxu1 %vm165_vm2, %v380_v58 }
 0x554   :  { %1323 = vmatpush3.msra.mxu1 %v1527_v0  ;;  %1330 = vmatprep.mubr.msk.f32.mxu1 %vm1484_vm1, %v1483_v2 }
 0x555   :  { %1324 = vmatprep.subr.mxu1 %v1483_v2 }
 0x556   :  { %1325 = vmatpush3.msra.mxu1 %v1537_v3 }
 0x557   :  { %1326 = vmatprep.subr.mxu1 %v1483_v2 }
 0x558   :  { %1327 = vmatpush3.msra.mxu1 %v1548_v5 }
 0x559   :  { %1328 = vmatprep.subr.mxu1 %v1483_v2 }
 0x55a   :  { %1329 = vmatpush3.msra.mxu1 %v1560_v7 }
 0x55b   :  { %1344 = vmatprep.subr.mxu1 %v1483_v2 }
 0x613   :  { %v452_v59 = vpop.f32.mrf.mxu1 }
 0x614   :  { %v463_v60 = vadd.f32 %v452_v59, %v1595_v10  ;;  %v456_v63 = vadd.f32 %v452_v59, %v137_v62 }
 0x615   :  { %v1310_v61 = vpop.f32.mrf.mxu1 }
 0x616   :  { %465 = vrot.lane.b32.xlu1 %v463_v60, %s1485_s12  ;;  %v1192_v1 = vmul.f32 -1.442695, %v456_v63 }
 0x618   :  { %1375 = vpow2.f32 %v1192_v1 }
 0x625   :  { %v1376_v4 = vpop.eup %1375 }
 0x626   :  { %v460_v6 = vadd.f32 1.0, %v1376_v4 }
 0x628   :  { %1377 = vrcp.f32 %v460_v6 }
 0x635   :  { %v1378_v8 = vpop.eup %1377 }
 0x636   :  { %v475_v20 = vsub.f32 1.0, %v1378_v8  ;;  %v481_v22 = vmul.f32 %v1378_v8, %v377_v55 }
 0x688   :  { %v466_v9 = vpop.permute.xlu1 %465 }
 0x689   :  { %v468_v11 = vmul.f32 %v1378_v8, %v466_v9 }
 0x68b   :  { %470 = vrot.lane.b32.xlu0 %v468_v11, %s1485_s12 }
 0x6fd   :  { %v471_v12 = vpop.permute.xlu0 %470 }
 0x6fe   :  { %v473_v13 = vadd.f32 %v471_v12, %v137_v62 }
 0x700   :  { %1379 = vtanh.f32 %v473_v13 }
 0x70d   :  { %v1380_v18 = vpop.eup %1379 }
 0x70e   :  { %477 = vrot.lane.b32.xlu1 %v1380_v18, %s1486_s4 }
 0x780   :  { %v478_v21 = vpop.permute.xlu1 %477 }
 0x781   :  { %v480_v23 = vmul.f32 %v478_v21, %v475_v20 }
 0x783   :  { %v482_v24 = vadd.f32 %v481_v22, %v480_v23 }
 0x785   :  { %484 = vrot.lane.b32.xlu0 %v482_v24, %s1486_s4 }
 0x7f7   :  { %v485_v33 = vpop.permute.xlu0 %484 }
 0x7f8   :  { %488 = vst.msk [vmem:[#allocation2 + $0x10] sm:$0xff] %vm165_vm2, %v485_v33  ;;  %1320 = vmatmul.mubr.msk.f32.vlgmr.msra.gmra.mxu0 %vm165_vm2, %v485_v33 }
 0x7f9   :  { %1334 = vmatpush3.msra.mxu0 %v1527_v0  ;;  %1341 = vmatprep.mubr.msk.f32.mxu0 %vm1484_vm1, %v1483_v2 }
 0x7fa   :  { %1335 = vmatprep.subr.mxu0 %v1483_v2 }
 0x7fb   :  { %1336 = vmatpush3.msra.mxu0 %v1537_v3 }
 0x7fc   :  { %1337 = vmatprep.subr.mxu0 %v1483_v2 }
 0x7fd   :  { %1338 = vmatpush3.msra.mxu0 %v1548_v5 }
 0x7fe   :  { %1339 = vmatprep.subr.mxu0 %v1483_v2 }
 0x7ff   :  { %1340 = vmatpush3.msra.mxu0 %v1560_v7 }
 0x8b8   :  { %v557_v34 = vpop.f32.mrf.mxu0 }
 0x8b9   :  { %v568_v35 = vadd.f32 %v557_v34, %v1595_v10  ;;  %v561_v38 = vadd.f32 %v557_v34, %v142_v37 }
 0x8ba   :  { %v1321_v36 = vpop.f32.mrf.mxu0 }
 0x8bb   :  { %570 = vrot.lane.b32.xlu1 %v568_v35, %s1485_s12  ;;  %v1194_v39 = vmul.f32 -1.442695, %v561_v38  ;;  %v157_v36 = vadd.f32 %v1602_v15, %v1682_v31  ;;  %v1201_v31 = vld [vmem:[%s1766_s5] ss:$0 sm:$0xff] }
 0x8bd   :  { %1381 = vpow2.f32 %v1194_v39 }
 0x8ca   :  { %v1382_v40 = vpop.eup %1381 }
 0x8cb   :  { %v565_v41 = vadd.f32 1.0, %v1382_v40 }
 0x8cd   :  { %1383 = vrcp.f32 %v565_v41 }
 0x8da   :  { %v1384_v42 = vpop.eup %1383 }
 0x8db   :  { %v580_v48 = vsub.f32 1.0, %v1384_v42  ;;  %v586_v50 = vmul.f32 %v1384_v42, %v482_v24 }
 0x92d   :  { %v571_v43 = vpop.permute.xlu1 %570 }
 0x92e   :  { %v573_v44 = vmul.f32 %v1384_v42, %v571_v43 }
 0x930   :  { %575 = vrot.lane.b32.xlu0 %v573_v44, %s1485_s12  ;;  %v1487_v44 = vmov 32  }
 0x931   :  { %1361 = vset.pattern.permute.xlu1 %v1487_v44  ;;  %1362 = vset.pattern.permute.xlu0 %v1487_v44 }
 0x9a2   :  { %v576_v45 = vpop.permute.xlu0 %575 }
 0x9a3   :  { %v578_v46 = vadd.f32 %v576_v45, %v142_v37 }
 0x9a5   :  { %1385 = vtanh.f32 %v578_v46 }
 0x9b2   :  { %v1386_v47 = vpop.eup %1385 }
 0x9b3   :  { %582 = vrot.lane.b32.xlu1 %v1386_v47, %s1486_s4 }
 0xa25   :  { %v583_v49 = vpop.permute.xlu1 %582 }
 0xa26   :  { %v585_v51 = vmul.f32 %v583_v49, %v580_v48 }
 0xa28   :  { %v587_v52 = vadd.f32 %v586_v50, %v585_v51 }
 0xa2a   :  { %589 = vrot.lane.b32.xlu0 %v587_v52, %s1486_s4 }
 0xa9c   :  { %v590_v53 = vpop.permute.xlu0 %589 }
 0xa9d   :  { %593 = vst.msk [vmem:[#allocation2 + $0x18] sm:$0xff] %vm165_vm2, %v590_v53  ;;  %1331 = vmatmul.mubr.msk.f32.vlgmr.msra.gmra.mxu1 %vm165_vm2, %v590_v53 }
 0xa9e   :  { %1345 = vmatpush3.msra.mxu1 %v1527_v0  ;;  %1352 = vmatprep.mubr.msk.f32.mxu1 %vm1484_vm1, %v1483_v2  ;;  %v147_v0 = vadd.f32 %v1602_v15, %v146_v27  ;;  %v909_v15 = vld [vmem:[#allocation2] sm:$0xff] }
 0xa9f   :  { %1346 = vmatprep.subr.mxu1 %v1483_v2  ;;  %v923_v47 = vmul.f32 %v1201_v31, %v909_v15 }
 0xaa0   :  { %1347 = vmatpush3.msra.mxu1 %v1537_v3 }
 0xaa1   :  { %1348 = vmatprep.subr.mxu1 %v1483_v2  ;;  %v930_v49 = vsel %vm165_vm2, %v923_v47, 0.0 }
 0xaa2   :  { %1349 = vmatpush3.msra.mxu1 %v1548_v5 }
 0xaa3   :  { %1350 = vmatprep.subr.mxu1 %v1483_v2 }
 0xaa4   :  { %1351 = vmatpush3.msra.mxu1 %v1560_v7  ;;  %v912_v48 = vld [vmem:[#allocation2 + $0x18] sm:$0xff] }
 0xaa5   :  { %v926_v50 = vmul.f32 %v1201_v31, %v912_v48 }
 0xb5d   :  { %v662_v54 = vpop.f32.mrf.mxu1 }
 0xb5e   :  { %v673_v55 = vadd.f32 %v662_v54, %v1595_v10  ;;  %v666_v57 = vadd.f32 %v662_v54, %v147_v0 }
 0xb5f   :  { %v1332_v56 = vpop.f32.mrf.mxu1 }
 0xb60   :  { %675 = vrot.lane.b32.xlu1 %v673_v55, %s1485_s12  ;;  %v1196_v58 = vmul.f32 -1.442695, %v666_v57 }
 0xb62   :  { %1387 = vpow2.f32 %v1196_v58 }
 0xb6f   :  { %v1388_v3 = vpop.eup %1387 }
 0xb70   :  { %v670_v59 = vadd.f32 1.0, %v1388_v3  ;;  %v910_v3 = vld [vmem:[#allocation2 + $0x8] sm:$0xff] }
 0xb72   :  { %1389 = vrcp.f32 %v670_v59  ;;  %v924_v59 = vmul.f32 %v1201_v31, %v910_v3 }
 0xb7f   :  { %v1390_v60 = vpop.eup %1389 }
 0xb80   :  { %v685_v63 = vsub.f32 1.0, %v1390_v60  ;;  %v691_v4 = vmul.f32 %v1390_v60, %v587_v52  ;;  %v939_v52 = vsel %vm165_vm2, %v926_v50, 0.0 }
 0xbd2   :  { %v676_v5 = vpop.permute.xlu1 %675 }
 0xbd3   :  { %v678_v61 = vmul.f32 %v1390_v60, %v676_v5  ;;  %v911_v60 = vld [vmem:[#allocation2 + $0x10] sm:$0xff]  ;;  %v933_v5 = vsel %vm165_vm2, %v924_v59, 0.0  ;;  %v1061_v59 = vlaneseq }
 0xbd5   :  { %680 = vrot.lane.b32.xlu0 %v678_v61, %s1485_s12  ;;  %v925_v61 = vmul.f32 %v1201_v31, %v911_v60 }
 0xc47   :  { %v681_v2 = vpop.permute.xlu0 %680 }
 0xc48   :  { %v683_v7 = vadd.f32 %v681_v2, %v147_v0 }
 0xc4a   :  { %1391 = vtanh.f32 %v683_v7  ;;  %v936_v7 = vsel %vm165_vm2, %v925_v61, 0.0 }
 0xc57   :  { %v1392_v62 = vpop.eup %1391 }
 0xc58   :  { %687 = vrot.lane.b32.xlu1 %v1392_v62, %s1486_s4 }
 0xcca   :  { %v688_v1 = vpop.permute.xlu1 %687 }
 0xccb   :  { %v690_v6 = vmul.f32 %v688_v1, %v685_v63 }
 0xccd   :  { %v692_v8 = vadd.f32 %v691_v4, %v690_v6 }
 0xccf   :  { %694 = vrot.lane.b32.xlu0 %v692_v8, %s1486_s4 }
 0xd41   :  { %v695_v9 = vpop.permute.xlu0 %694 }
 0xd42   :  { %698 = vst.msk [vmem:[#allocation2 + $0x20] sm:$0xff] %vm165_vm2, %v695_v9  ;;  %1342 = vmatmul.mubr.msk.f32.vlgmr.msra.gmra.mxu0 %vm165_vm2, %v695_v9 }
 0xd49   :  { %v913_v2 = vld [vmem:[#allocation2 + $0x20] sm:$0xff] }
 0xd4a   :  { %v927_v62 = vmul.f32 %v1201_v31, %v913_v2 }
 0xd4c   :  { %v942_v63 = vsel %vm165_vm2, %v927_v62, 0.0 }
 0xe02   :  { %v767_v11 = vpop.f32.mrf.mxu0 }
 0xe03   :  { %v778_v12 = vadd.f32 %v767_v11, %v1595_v10  ;;  %v771_v16 = vadd.f32 %v767_v11, %v152_v14 }
 0xe04   :  { %v1343_v13 = vpop.f32.mrf.mxu0 }
 0xe05   :  { %780 = vrot.lane.b32.xlu1 %v778_v12, %s1485_s12  ;;  %v1198_v17 = vmul.f32 -1.442695, %v771_v16 }
 0xe07   :  { %1393 = vpow2.f32 %v1198_v17 }
 0xe14   :  { %v1394_v18 = vpop.eup %1393 }
 0xe15   :  { %v775_v19 = vadd.f32 1.0, %v1394_v18 }
 0xe17   :  { %1395 = vrcp.f32 %v775_v19 }
 0xe24   :  { %v1396_v20 = vpop.eup %1395 }
 0xe25   :  { %v790_v26 = vsub.f32 1.0, %v1396_v20  ;;  %v796_v28 = vmul.f32 %v1396_v20, %v692_v8 }
 0xe77   :  { %v781_v21 = vpop.permute.xlu1 %780 }
 0xe78   :  { %v783_v22 = vmul.f32 %v1396_v20, %v781_v21 }
 0xe7a   :  { %785 = vrot.lane.b32.xlu0 %v783_v22, %s1485_s12 }
 0xeec   :  { %v786_v23 = vpop.permute.xlu0 %785 }
 0xeed   :  { %v788_v24 = vadd.f32 %v786_v23, %v152_v14 }
 0xeef   :  { %1397 = vtanh.f32 %v788_v24 }
 0xefc   :  { %v1398_v25 = vpop.eup %1397 }
 0xefd   :  { %792 = vrot.lane.b32.xlu1 %v1398_v25, %s1486_s4 }
 0xf6f   :  { %v793_v27 = vpop.permute.xlu1 %792 }
 0xf70   :  { %v795_v29 = vmul.f32 %v793_v27, %v790_v26 }
 0xf72   :  { %v797_v30 = vadd.f32 %v796_v28, %v795_v29 }
 0xf74   :  { %799 = vrot.lane.b32.xlu0 %v797_v30, %s1486_s4 }
 0xfe6   :  { %v800_v32 = vpop.permute.xlu0 %799 }
 0xfe7   :  { %803 = vst.msk [vmem:[#allocation2 + $0x28] sm:$0xff] %vm165_vm2, %v800_v32  ;;  %1353 = vmatmul.mubr.msk.f32.vlgmr.msra.gmra.mxu1 %vm165_vm2, %v800_v32 }
 0xfee   :  { %v914_v51 = vld [vmem:[#allocation2 + $0x28] sm:$0xff] }
 0xfef   :  { %v928_v53 = vmul.f32 %v1201_v31, %v914_v51 }
 0xff1   :  { %v945_v54 = vsel %vm165_vm2, %v928_v53, 0.0 }
0x10a7   :  { %v872_v33 = vpop.f32.mrf.mxu1 }
0x10a8   :  { %v883_v34 = vadd.f32 %v872_v33, %v1595_v10  ;;  %v876_v37 = vadd.f32 %v872_v33, %v157_v36 }
0x10a9   :  { %v1354_v35 = vpop.f32.mrf.mxu1 }
0x10aa   :  { %885 = vrot.lane.b32.xlu1 %v883_v34, %s1485_s12  ;;  %v1200_v38 = vmul.f32 -1.442695, %v876_v37 }
0x10ac   :  { %1399 = vpow2.f32 %v1200_v38 }
0x10b9   :  { %v1400_v39 = vpop.eup %1399 }
0x10ba   :  { %v880_v40 = vadd.f32 1.0, %v1400_v39 }
0x10bc   :  { %1401 = vrcp.f32 %v880_v40 }
0x10c9   :  { %v1402_v41 = vpop.eup %1401 }
0x10ca   :  { %v895_v55 = vsub.f32 1.0, %v1402_v41  ;;  %v901_v0 = vmul.f32 %v1402_v41, %v797_v30 }
0x111c   :  { %v886_v42 = vpop.permute.xlu1 %885 }
0x111d   :  { %v888_v43 = vmul.f32 %v1402_v41, %v886_v42 }
0x111f   :  { %890 = vrot.lane.b32.xlu0 %v888_v43, %s1485_s12 }
0x1191   :  { %v891_v10 = vpop.permute.xlu0 %890 }
0x1192   :  { %v893_v45 = vadd.f32 %v891_v10, %v157_v36 }
0x1194   :  { %1403 = vtanh.f32 %v893_v45 }
0x11a1   :  { %v1404_v46 = vpop.eup %1403 }
0x11a2   :  { %897 = vrot.lane.b32.xlu1 %v1404_v46, %s1486_s4 }
0x11c6   :  { %931 = vadd.xlane.f32.xlu1 %v930_v49 }
0x11ca   :  { %940 = vadd.xlane.f32.xlu1 %v939_v52 }
0x11ce   :  { %946 = vadd.xlane.f32.xlu1 %v945_v54 }
0x11df   :  { %952 = vperm.xlu1 %1361, %v1201_v31  }
0x1214   :  { %v898_v56 = vpop.permute.xlu1 %897 }
0x1215   :  { %v900_v57 = vmul.f32 %v898_v56, %v895_v55 }
0x1217   :  { %v902_v58 = vadd.f32 %v901_v0, %v900_v57 }
0x1219   :  { %904 = vrot.lane.b32.xlu0 %v902_v58, %s1486_s4 }
0x1238   :  { %934 = vadd.xlane.f32.xlu0 %v933_v5 }
0x123c   :  { %937 = vadd.xlane.f32.xlu0 %v936_v7 }
0x1240   :  { %943 = vadd.xlane.f32.xlu0 %v942_v63 }
0x124f   :  { %v932_v9 = vpop.xlane.xlu1 %931 }
0x1253   :  { %v941_v11 = vpop.xlane.xlu1 %940 }
0x1257   :  { %v947_v13 = vpop.xlane.xlu1 %946 }
0x125b   :  { %v953_v16 = vpop.permute.xlu1 %952 }
0x125c   :  { %v955_v18 = vadd.f32 %v953_v16, %v932_v9  ;;  %v958_v25 = vadd.f32 %v953_v16, %v941_v11  ;;  %v960_v27 = vadd.f32 %v953_v16, %v947_v13 }
0x125e   :  { %v1202_v22 = vmul.f32 -1.442695, %v955_v18  ;;  %v1205_v28 = vmul.f32 -1.442695, %v958_v25  ;;  %v1207_v29 = vmul.f32 -1.442695, %v960_v27 }
0x128b   :  { %v905_v1 = vpop.permute.xlu0 %904 }
0x128c   :  { %908 = vst.msk [vmem:[#allocation2 + $0x30] sm:$0xff] %vm165_vm2, %v905_v1 }
0x1293   :  { %v915_v4 = vld [vmem:[#allocation2 + $0x30] sm:$0xff] }
0x1294   :  { %v929_v6 = vmul.f32 %v1201_v31, %v915_v4 }
0x1296   :  { %v948_v8 = vsel %vm165_vm2, %v929_v6, 0.0  ;;  %v1062_v6 = vand.u32 127, %v1061_v59 }
0x1297   :  { %949 = vadd.xlane.f32.xlu0 %v948_v8  ;;  %v1064_v8 = vshrl.u32 %v1061_v59, 7 }
0x12c1   :  { %v935_v12 = vpop.xlane.xlu0 %934 }
0x12c2   :  { %v956_v17 = vadd.f32 %v953_v16, %v935_v12 }
0x12c4   :  { %v1203_v21 = vmul.f32 -1.442695, %v956_v17 }
0x12c5   :  { %v938_v14 = vpop.xlane.xlu0 %937 }
0x12c6   :  { %v957_v19 = vadd.f32 %v953_v16, %v938_v14  ;;  %1405 = vpow2.f32 %v1203_v21 }
0x12c7   :  { %1407 = vpow2.f32 %v1202_v22  ;;  %v1065_v22 = vsub.s32 %v1062_v6, %v1064_v8 }
0x12c8   :  { %v1204_v23 = vmul.f32 -1.442695, %v957_v19 }
0x12c9   :  { %v944_v20 = vpop.xlane.xlu0 %943 }
0x12ca   :  { %v959_v24 = vadd.f32 %v953_v16, %v944_v20  ;;  %1409 = vpow2.f32 %v1204_v23 }
0x12cc   :  { %v1206_v26 = vmul.f32 -1.442695, %v959_v24 }
0x12ce   :  { %1411 = vpow2.f32 %v1206_v26 }
0x12cf   :  { %1413 = vpow2.f32 %v1205_v28 }
0x12d0   :  { %1415 = vpow2.f32 %v1207_v29 }
0x12d3   :  { %v1406_v30 = vpop.eup %1405 }
0x12d4   :  { %v1408_v32 = vpop.eup %1407  ;;  %v984_v34 = vadd.f32 1.0, %v1406_v30 }
0x12d5   :  { %v983_v35 = vadd.f32 1.0, %v1408_v32 }
0x12d6   :  { %1417 = vrcp.f32 %v984_v34 }
0x12d7   :  { %v1410_v33 = vpop.eup %1409  ;;  %1419 = vrcp.f32 %v983_v35 }
0x12d8   :  { %v985_v36 = vadd.f32 1.0, %v1410_v33 }
0x12da   :  { %1421 = vrcp.f32 %v985_v36 }
0x12db   :  { %v1412_v37 = vpop.eup %1411 }
0x12dc   :  { %v1414_v38 = vpop.eup %1413  ;;  %v987_v39 = vadd.f32 1.0, %v1412_v37 }
0x12dd   :  { %v986_v42 = vadd.f32 1.0, %v1414_v38  ;;  %v1416_v43 = vpop.eup %1415 }
0x12de   :  { %1423 = vrcp.f32 %v987_v39  ;;  %v988_v10 = vadd.f32 1.0, %v1416_v43 }
0x12e3   :  { %v1418_v45 = vpop.eup %1417 }
0x12e4   :  { %v1420_v46 = vpop.eup %1419  ;;  %v1027_v31 = vsub.f32 1.0, %v1418_v45 }
0x12e5   :  { %v1026_v50 = vsub.f32 1.0, %v1420_v46 }
0x12e7   :  { %v1422_v15 = vpop.eup %1421 }
0x12e8   :  { %v1028_v47 = vsub.f32 1.0, %v1422_v15 }
0x12eb   :  { %v1424_v48 = vpop.eup %1423 }
0x12ec   :  { %v1030_v53 = vsub.f32 1.0, %v1424_v48 }
0x1320   :  { %v950_v40 = vpop.xlane.xlu0 %949 }
0x1321   :  { %v961_v41 = vadd.f32 %v953_v16, %v950_v40 }
0x1323   :  { %v1208_v44 = vmul.f32 -1.442695, %v961_v41 }
0x1325   :  { %1425 = vpow2.f32 %v1208_v44 }
0x1326   :  { %1427 = vrcp.f32 %v986_v42 }
0x1327   :  { %1429 = vrcp.f32 %v988_v10 }
0x1328   :  { %1431 = vlog2.f32 %v1420_v46 }
0x1329   :  { %1433 = vlog2.f32 %v1418_v45 }
0x132a   :  { %1435 = vlog2.f32 %v1027_v31 }
0x132b   :  { %1437 = vlog2.f32 %v1422_v15 }
0x132c   :  { %1439 = vlog2.f32 %v1028_v47 }
0x1332   :  { %v1426_v49 = vpop.eup %1425 }
0x1333   :  { %v1428_v51 = vpop.eup %1427  ;;  %v989_v52 = vadd.f32 1.0, %v1426_v49 }
0x1334   :  { %v1029_v54 = vsub.f32 1.0, %v1428_v51  ;;  %v1430_v55 = vpop.eup %1429 }
0x1335   :  { %1441 = vrcp.f32 %v989_v52  ;;  %v1031_v56 = vsub.f32 1.0, %v1430_v55  ;;  %v1432_v0 = vpop.eup %1431 }
0x1336   :  { %1443 = vlog2.f32 %v1026_v50  ;;  %v1434_v57 = vpop.eup %1433  ;;  %v1006_v4 = vmul.f32 0.6931472, %v1432_v0 }
0x1337   :  { %1445 = vlog2.f32 %v1424_v48  ;;  %v1436_v58 = vpop.eup %1435  ;;  %v1008_v61 = vmul.f32 0.6931472, %v1434_v57 }
0x1338   :  { %1447 = vlog2.f32 %v1428_v51  ;;  %v1438_v3 = vpop.eup %1437  ;;  %v1036_v1 = vmul.f32 0.6931472, %v1436_v58  ;;  %v1019_v20 = vmax.f32 %v1006_v4, -100.0 }
0x1339   :  { %1449 = vlog2.f32 %v1030_v53  ;;  %v1440_v60 = vpop.eup %1439  ;;  %v1010_v7 = vmul.f32 0.6931472, %v1438_v3  ;;  %v1020_v13 = vmax.f32 %v1008_v61, -100.0  ;;  %v1004_v53 = vld [vmem:[%s1762_s1] sm:$0x7f]  ;;  %s1488_s1 = smov [#allocation3]  }
0x133a   :  { %1451 = vlog2.f32 %v1029_v54  ;;  %v1038_v11 = vmul.f32 0.6931472, %v1440_v60  ;;  %v1048_v21 = vmax.f32 %v1036_v1, -100.0  ;;  %v1066_v35 = vrot.slane %v1019_v20, %v1065_v22  ;;  %s1171_s28 = sshll.u32 %s1488_s1, 4  ;;  %s1172_s28 = int_to_ptr.vmem [resolvable:$true] %s1171_s28 }
0x133b   :  { %1453 = vlog2.f32 %v1430_v55  ;;  %v1021_v18 = vmax.f32 %v1010_v7, -100.0  ;;  %v1070_v28 = vrot.slane %v1020_v13, %v1065_v22  ;;  %s1461_s29 = scalar_lea.vmem %s1172_s28, 16  ;;  %s1465_s30 = scalar_lea.vmem %s1172_s28, 32 }
0x133c   :  { %1455 = vlog2.f32 %v1031_v56  ;;  %v1049_v25 = vmax.f32 %v1038_v11, -100.0  ;;  %v1120_v36 = vrot.slane %v1048_v21, %v1065_v22  ;;  %p1462_p0 = scmp.ne.s32.totalorder %s1172_s28, %s1461_s29  ;;  %p1466_p1 = scmp.lt.s32.totalorder %s1172_s28, %s1172_s28 }
0x133d   :  { %v1074_v32 = vrot.slane %v1021_v18, %v1065_v22  ;;  %v1092_v41 = vsel %vm1091_vm3, %v1070_v28, %v1066_v35  ;;  %p1467_p2 = scmp.lt.s32.totalorder %s1465_s30, %s1461_s29 }
0x133e   :  { %v1124_v38 = vrot.slane %v1049_v25, %v1065_v22 }
0x133f   :  { %v1094_v44 = vsel %vm1093_vm4, %v1074_v32, %v1092_v41  ;;  %p1468_p3 = por %p1467_p2, %p1466_p1 }
0x1341   :  { %p1469_p4 = pnand %p1468_p3, %p1462_p0 }
0x1342   :  { %v1442_v5 = vpop.eup %1441 }
0x1343   :  { %v1444_v2 = vpop.eup %1443  ;;  %1457 = vlog2.f32 %v1442_v5  ;;  %v1032_v62 = vsub.f32 1.0, %v1442_v5  ;;  %v1105_v5 = vsub.f32 1.0, %v1004_v53 }
0x1344   :  { %v1446_v63 = vpop.eup %1445  ;;  %v1034_v14 = vmul.f32 0.6931472, %v1444_v2 }
0x1345   :  { %v1448_v9 = vpop.eup %1447  ;;  %1459 = vlog2.f32 %v1032_v62  ;;  %v1014_v17 = vmul.f32 0.6931472, %v1446_v63 }
0x1346   :  { %v1450_v12 = vpop.eup %1449  ;;  %v1012_v19 = vmul.f32 0.6931472, %v1448_v9  ;;  %v1047_v27 = vmax.f32 %v1034_v14, -100.0 }
0x1347   :  { %v1452_v16 = vpop.eup %1451  ;;  %v1042_v24 = vmul.f32 0.6931472, %v1450_v12  ;;  %v1023_v30 = vmax.f32 %v1014_v17, -100.0 }
0x1348   :  { %v1454_v23 = vpop.eup %1453  ;;  %v1040_v26 = vmul.f32 0.6931472, %v1452_v16  ;;  %v1022_v34 = vmax.f32 %v1012_v19, -100.0  ;;  %v1116_v42 = vrot.slane %v1047_v27, %v1065_v22 }
0x1349   :  { %v1456_v29 = vpop.eup %1455  ;;  %v1016_v33 = vmul.f32 0.6931472, %v1454_v23  ;;  %v1051_v37 = vmax.f32 %v1042_v24, -100.0  ;;  %v1082_v43 = vrot.slane %v1023_v30, %v1065_v22 }
0x134a   :  { %v1044_v39 = vmul.f32 0.6931472, %v1456_v29  ;;  %v1050_v40 = vmax.f32 %v1040_v26, -100.0  ;;  %v1078_v46 = vrot.slane %v1022_v34, %v1065_v22  ;;  %v1141_v15 = vsel %vm1091_vm3, %v1120_v36, %v1116_v42 }
0x134b   :  { %v1024_v45 = vmax.f32 %v1016_v33, -100.0  ;;  %v1132_v47 = vrot.slane %v1051_v37, %v1065_v22  ;;  %v1142_v48 = vsel %vm1093_vm4, %v1124_v38, %v1141_v15 }
0x134c   :  { %v1052_v50 = vmax.f32 %v1044_v39, -100.0  ;;  %v1096_v51 = vsel %vm1095_vm5, %v1078_v46, %v1094_v44  ;;  %v1128_v52 = vrot.slane %v1050_v40, %v1065_v22 }
0x134d   :  { %v1098_v56 = vsel %vm1097_vm6, %v1082_v43, %v1096_v51  ;;  %v1086_v0 = vrot.slane %v1024_v45, %v1065_v22 }
0x134e   :  { %v1143_v57 = vsel %vm1095_vm5, %v1128_v52, %v1142_v48  ;;  %v1136_v61 = vrot.slane %v1052_v50, %v1065_v22 }
0x134f   :  { %v1144_v59 = vsel %vm1097_vm6, %v1132_v47, %v1143_v57  ;;  %v1100_v60 = vsel %vm1099_vm7, %v1086_v0, %v1098_v56 }
0x1350   :  { %v1458_v10 = vpop.eup %1457  ;;  %v1145_v62 = vsel %vm1099_vm7, %v1136_v61, %v1144_v59 }
0x1351   :  { %v1018_v31 = vmul.f32 0.6931472, %v1458_v10 }
0x1352   :  { %v1460_v49 = vpop.eup %1459 }
0x1353   :  { %v1025_v54 = vmax.f32 %v1018_v31, -100.0  ;;  %v1046_v55 = vmul.f32 0.6931472, %v1460_v49 }
0x1355   :  { %v1053_v58 = vmax.f32 %v1046_v55, -100.0  ;;  %v1090_v3 = vrot.slane %v1025_v54, %v1065_v22 }
0x1357   :  { %v1102_v2 = vsel %vm1101_vm8, %v1090_v3, %v1100_v60  ;;  %v1140_v7 = vrot.slane %v1053_v58, %v1065_v22 }
0x1358   :  { %v1104_v1 = vmul.f32 %v1102_v2, %v1004_v53 }
0x1359   :  { %v1146_v63 = vsel %vm1101_vm8, %v1140_v7, %v1145_v62 }
0x135a   :  { %v1148_v4 = vmul.f32 %v1146_v63, %v1105_v5 }
0x135c   :  { %v1149_v6 = vadd.f32 %v1148_v4, %v1104_v1 }
0x135e   :  { %v1151_v8 = vsel %vm1150_vm9, %v1149_v6, 0.0 }
0x135f   :  { %1152 = vadd.xlane.f32.xlu0 %v1151_v8 }
0x13e8   :  { %v1153_v9 = vpop.xlane.xlu0 %1152 }
0x13e9   :  { %v1155_v11 = vsel %vm1154_vm10, %v1153_v9, 0.0 }
0x13ea   :  { %v1156_v12 = vrot.slane %v1155_v11, 4 }
0x13ec   :  { %v1157_v13 = vadd.f32 %v1156_v12, %v1155_v11 }
0x13ee   :  { %v1158_v14 = vrot.slane %v1157_v13, 2 }
0x13f0   :  { %v1159_v16 = vadd.f32 %v1158_v14, %v1157_v13 }
0x13f2   :  { %v1160_v17 = vrot.slane %v1159_v16, 1 }
0x13f4   :  { %v1161_v18 = vadd.f32 %v1160_v17, %v1159_v16 }
0x13f6   :  { %v1162_v19 = vsub.f32 0.0, %v1161_v18 }
0x13f8   :  { %1164 = vst.msk [vmem:[#allocation3] sm:$0x1] %vm1163_vm11, %v1162_v19 }
0x13f9   :  { %1472 = shalt.err (!%p1469_p4)
}
0x13fa   :  { %1174 = dma.vmem_to_hbm [thread:$0]  %s1172_s28, 16, %s1767_s6, [#allocation4]  }
0x13fb   :  { %1481 = dma.done.wait [#allocation4], 16  }
0x13fc   :  { %1482 = vsyncadd [#allocation4], 4294967280 }
0x13fd   :  { %1178 = vsyncpa [#allocation4], 1 }

</bundles_post_ra>
